<compile_context>
chip_gen: v6e
topology: v6e:2x2x1
jax: 0.10.0
libtpu: 0.0.40
codegen_flags: <defaults>
</compile_context>

<pallas_src>
import functools

import jax
import jax.numpy as jnp
import numpy as np
from jax import lax
from jax.experimental import pallas as pl
from jax.experimental.pallas import tpu as pltpu

SQRT_HALF = 0.7071067811865476
GELU_TANH_C = 0.7978845608028654  # sqrt(2/pi)
LANE = 128
TARGET_TB = 2048   # target rows per tile for large batches
MAX_TB = 2048      # cap keeps the footprint well inside v7x's 64 MiB VMEM


def _gelu(x, approx):
    if approx:
        # tanh approximation -> EUP slot (idle otherwise), relieving the saturated VALU slot
        return 0.5 * x * (1.0 + jnp.tanh(GELU_TANH_C * (x + 0.044715 * x * x * x)))
    # exact (erf-based) GELU, matching torch.nn.GELU() default semantics
    return 0.5 * x * (1.0 + lax.erf(x * SQRT_HALF))


def _round_up(x, m):
    return ((x + m - 1) // m) * m


# --------------------------------- kernel ---------------------------------

def mlpnet_kernel(c_ref,
                  ew0_ref, eb0_ref,     # contextembed layer 0: Linear -> GELU
                  fw1_ref, fb1_ref,     # fused: contextembed layer 1 @ (down layer1 Linear+BN) -> GELU
                  dw2_ref, db2_ref,     # down blk layer 2 (Linear+BN folded) -> GELU
                  ow1_ref, ob1_ref,     # out blk layer 1 (Linear+BN folded, 1/1.414 folded, lane-padded) -> GELU
                  ow2_ref, ob2_ref,     # out blk layer 2 (Linear, lane-padded)
                  out_ref,
                  *, approx_gelu):
    cd = ew0_ref.dtype  # compute dtype for MXU operands (f32, or bf16 on v6e/v7x)
    c = c_ref[...]

    # ---- contextembed layer 0 ----
    h = _gelu(jnp.dot(c, ew0_ref[...], preferred_element_type=jnp.float32) + eb0_ref[...],
              approx_gelu).astype(cd)

    # ---- contextembed layer 1 fused with down-block layer 1 (Linear+BN) ----
    x1 = _gelu(jnp.dot(h, fw1_ref[...], preferred_element_type=jnp.float32) + fb1_ref[...],
               approx_gelu).astype(cd)

    # ---- down block layer 2 ----
    x2 = _gelu(jnp.dot(x1, dw2_ref[...], preferred_element_type=jnp.float32) + db2_ref[...],
               approx_gelu).astype(cd)

    # residual on x1 (is_res=True, in_fs != out_fs); the /1.414 scale is folded into ow1
    s = x1 + x2

    # TODO(synk): nn.Dropout(0.5) implemented as identity (eval-mode semantics).

    # ---- out ResidualMLPBlock (is_res=False, is_out=True) ----
    y1 = _gelu(jnp.dot(s, ow1_ref[...], preferred_element_type=jnp.float32) + ob1_ref[...],
               approx_gelu).astype(cd)
    y2 = jnp.dot(y1, ow2_ref[...], preferred_element_type=jnp.float32) + ob2_ref[...]

    # store only the real (unpadded) output columns -> ~32x less HBM writeback
    out_ref[...] = y2[:, :out_ref.shape[1]].astype(out_ref.dtype)


# ------------------------------- wrapper -----------------------------------

def fold_params(params, dtype=jnp.float32):
    """Fold eval-mode BatchNorm, the residual 1/1.414 scale, and the ew1∘dw1 linear
    pair into the kernel weights; lane-pad the tiny out-block feature dim so the last
    two matmuls stay 128-wide (the kernel slices back before the store).
    Returns (kernel_params, in_fs)."""
    (ew0, eb0, ew1, eb1,
     dw1, db1, ds1, dt1,
     dw2, db2, ds2, dt2,
     ow1, ob1, os1, ot1,
     ow2, ob2) = params

    # BN fold:  (x@W + b)*s + t  ==  x@(W*s) + (b*s + t)
    dw1f, db1f = dw1 * ds1, db1 * ds1 + dt1
    dw2f, db2f = dw2 * ds2, db2 * ds2 + dt2
    ow1f, ob1f = ow1 * os1, ob1 * os1 + ot1

    # linear fold (no nonlinearity between ew1 and dw1):
    #   (h @ ew1 + eb1) @ dw1f + db1f  ==  h @ (ew1 @ dw1f) + (eb1 @ dw1f + db1f)
    fw1 = ew1 @ dw1f
    fb1 = eb1 @ dw1f + db1f

    # residual-scale fold:  ((x1+x2)/1.414) @ W  ==  (x1+x2) @ (W/1.414)
    ow1f = ow1f * (1.0 / 1.414)

    # lane-pad the (tiny) out-block feature dim; padded cols see gelu(0)=0 and padded
    # rows of ow2 are zero, so they contribute nothing to the real output columns.
    in_fs = ow2.shape[1]
    in_fs_pad = max(LANE, _round_up(in_fs, LANE))
    pad_c = in_fs_pad - in_fs
    ow1p = jnp.pad(ow1f, ((0, 0), (0, pad_c)))
    ob1p = jnp.pad(ob1f, ((0, 0), (0, pad_c)))
    ow2p = jnp.pad(ow2, ((0, pad_c), (0, pad_c)))
    ob2p = jnp.pad(ob2, ((0, 0), (0, pad_c)))

    ew0k, fw1k, dw2k, ow1k, ow2k = ew0, fw1, dw2f, ow1p, ow2p
    if dtype != jnp.float32:
        # bf16 weights (v6e/v7x): halves VMEM/vreg traffic, doubles MXU throughput;
        # biases stay f32 and every dot accumulates in f32.  Keep f32 on v5e.
        ew0k, fw1k, dw2k, ow1k, ow2k = (
            w.astype(dtype) for w in (ew0k, fw1k, dw2k, ow1k, ow2k))

    kernel_params = (ew0k, eb0, fw1k, fb1, dw2k, db2f, ow1k, ob1p, ow2k, ob2p)
    return kernel_params, in_fs


def _pick_tile(bs):
    # Large tiles (amortize per-step overhead), minimal batch padding, and >= 2 grid
    # steps when bs allows it so the "parallel" axis shards across both v7x TCs.
    min_grid = 2 if bs >= 16 else 1
    n_tiles = max(pl.cdiv(bs, TARGET_TB), min_grid)
    tb = _round_up(pl.cdiv(bs, n_tiles), 8)
    return min(tb, MAX_TB)


def mlpnet_forward(c, params, *, tb=None, approx_gelu=True, compute_dtype=jnp.float32):
    """c: (bs, n_context_fs) float32 -> (bs, in_fs) float32.

    approx_gelu=True uses the tanh GELU approximation (EUP-friendly); set False for
    exact torch.nn.GELU() (erf) numerics.  compute_dtype=jnp.bfloat16 casts weights
    and activations to bf16 (recommended on v6e/v7x; keep the f32 default on v5e)."""
    bs, d = c.shape
    kparams, in_fs = fold_params(params, dtype=compute_dtype)

    if tb is None:
        tb = _pick_tile(bs)
    tb = max(8, _round_up(tb, 8))
    bs_pad = pl.cdiv(bs, tb) * tb
    if bs_pad != bs:
        c = jnp.pad(c, ((0, bs_pad - bs), (0, 0)))
    if compute_dtype != jnp.float32:
        c = c.astype(compute_dtype)
    grid = bs_pad // tb

    c_spec = pl.BlockSpec((tb, d), lambda i: (i, 0))
    # constant index_map -> each weight/bias is DMA'd into VMEM once and reused
    full = lambda p: pl.BlockSpec(p.shape, lambda i: (0, 0))
    out_spec = pl.BlockSpec((tb, in_fs), lambda i: (i, 0))   # unpadded, full last dim

    # advisory cost estimate so XLA schedules/overlaps the call sensibly
    wshapes = [kparams[i].shape for i in (0, 2, 4, 6, 8)]
    flops = 2 * bs_pad * sum(k * n for k, n in wshapes)
    transcendentals = bs_pad * sum(n for _, n in wshapes[:4])        # 4 GELU layers
    bytes_accessed = int(c.size * c.dtype.itemsize + bs_pad * in_fs * 4
                         + sum(int(p.size) * p.dtype.itemsize for p in kparams))

    out = pl.pallas_call(
        functools.partial(mlpnet_kernel, approx_gelu=approx_gelu),
        out_shape=jax.ShapeDtypeStruct((bs_pad, in_fs), jnp.float32),
        grid_spec=pltpu.PrefetchScalarGridSpec(
            num_scalar_prefetch=0,
            grid=(grid,),
            in_specs=[c_spec] + [full(p) for p in kparams],
            out_specs=out_spec,
        ),
        compiler_params=pltpu.CompilerParams(
            dimension_semantics=("parallel",),
            vmem_limit_bytes=48 * 1024 * 1024,   # headroom above v5e's 16 MiB scoped default
        ),
        cost_estimate=pl.CostEstimate(flops=int(flops),
                                      transcendentals=int(transcendentals),
                                      bytes_accessed=bytes_accessed),
    )(c, *kparams)

    return out if bs_pad == bs else out[:bs]


# ----------------------- deterministic parameter construction -----------------------

def _linear(key, fan_in, fan_out):
    kw, kb = jax.random.split(key)
    # weights_init(): N(0, 0.02) for Linear weights; torch default uniform bias
    w = 0.02 * jax.random.normal(kw, (fan_in, fan_out), jnp.float32)
    bound = 1.0 / np.sqrt(fan_in)
    b = jax.random.uniform(kb, (1, fan_out), jnp.float32, -bound, bound)
    return w, b


def _batchnorm_affine(key, n, eps=1e-5):
    # weights_init(): gamma ~ N(1, 0.02), beta = 0; fresh running stats (mean=0, var=1)
    gamma = 1.0 + 0.02 * jax.random.normal(key, (1, n), jnp.float32)
    beta = jnp.zeros((1, n), jnp.float32)
    running_mean = jnp.zeros((1, n), jnp.float32)
    running_var = jnp.ones((1, n), jnp.float32)
    s = gamma / jnp.sqrt(running_var + eps)
    t = beta - running_mean * s
    return s, t


def init_params(key, in_fs, n_context_fs, n_infeat):
    ks = jax.random.split(key, 10)
    # contextembed: Linear(d, 2n) -> GELU -> Linear(2n, 2n)
    ew0, eb0 = _linear(ks[0], n_context_fs, 2 * n_infeat)
    ew1, eb1 = _linear(ks[1], 2 * n_infeat, 2 * n_infeat)
    # down block (n_downblk=1): 2n -> n (residual on x1)
    dw1, db1 = _linear(ks[2], 2 * n_infeat, n_infeat)
    ds1, dt1 = _batchnorm_affine(ks[3], n_infeat)
    dw2, db2 = _linear(ks[4], n_infeat, n_infeat)
    ds2, dt2 = _batchnorm_affine(ks[5], n_infeat)
    # out block: n -> in_fs, is_out=True
    ow1, ob1 = _linear(ks[6], n_infeat, in_fs)
    os1, ot1 = _batchnorm_affine(ks[7], in_fs)
    ow2, ob2 = _linear(ks[8], in_fs, in_fs)
    return (ew0, eb0, ew1, eb1,
            dw1, db1, ds1, dt1,
            dw2, db2, ds2, dt2,
            ow1, ob1, os1, ot1,
            ow2, ob2)


def mlpnet_reference(c, params, *, approx_gelu=False):
    # un-folded reference matching the PyTorch module (eval mode)
    (ew0, eb0, ew1, eb1,
     dw1, db1, ds1, dt1,
     dw2, db2, ds2, dt2,
     ow1, ob1, os1, ot1,
     ow2, ob2) = params
    g = lambda x: _gelu(x, approx_gelu)
    cemb = g(c @ ew0 + eb0) @ ew1 + eb1
    x1 = g((cemb @ dw1 + db1) * ds1 + dt1)
    x2 = g((x1 @ dw2 + db2) * ds2 + dt2)
    down = (x1 + x2) / 1.414
    y1 = g((down @ ow1 + ob1) * os1 + ot1)
    return y1 @ ow2 + ob2


if __name__ == "__main__":
    # small, MLPnet-consistent shapes: c is (bs, n_context_fs)
    bs, in_fs, n_context_fs, n_infeat = 8, 4, 32, 64

    key = jax.random.PRNGKey(0)
    k_x, k_p = jax.random.split(key)
    c = jax.random.normal(k_x, (bs, n_context_fs), jnp.float32)
    params = init_params(k_p, in_fs, n_context_fs, n_infeat)

    # exact-GELU path: matches torch.nn.GELU() (erf) semantics
    out = jax.block_until_ready(mlpnet_forward(c, params, approx_gelu=False))
    ref = jax.block_until_ready(mlpnet_reference(c, params, approx_gelu=False))
    np.testing.assert_allclose(np.asarray(out), np.asarray(ref), rtol=1e-4, atol=2e-5)

    # default fast path: tanh-approx GELU (EUP), checked against the matching reference
    out_a = jax.block_until_ready(mlpnet_forward(c, params))
    ref_a = jax.block_until_ready(mlpnet_reference(c, params, approx_gelu=True))
    np.testing.assert_allclose(np.asarray(out_a), np.asarray(ref_a), rtol=1e-4, atol=2e-5)

    # multi-tile grid + batch-padding path (bs not a multiple of tb)
    c2 = jax.random.normal(jax.random.PRNGKey(1), (50, n_context_fs), jnp.float32)
    out2 = jax.block_until_ready(mlpnet_forward(c2, params, tb=16, approx_gelu=False))
    ref2 = jax.block_until_ready(mlpnet_reference(c2, params, approx_gelu=False))
    np.testing.assert_allclose(np.asarray(out2), np.asarray(ref2), rtol=1e-4, atol=2e-5)

    # optional bf16 compute path (v6e/v7x): loose sanity check against the f32 reference
    out_bf = jax.block_until_ready(
        mlpnet_forward(c2, params, compute_dtype=jnp.bfloat16))
    ref_bf = jax.block_until_ready(mlpnet_reference(c2, params, approx_gelu=True))
    np.testing.assert_allclose(np.asarray(out_bf), np.asarray(ref_bf), rtol=0.1, atol=0.05)

    print("KERNEL_OK")
</pallas_src>

<mosaic_0001>
module attributes {stable_mosaic.version = 11 : i64} {
  func.func @mlpnet_kernel(%arg0: i32, %arg1: memref<8x32xf32, #tpu.memory_space<vmem>>, %arg2: memref<32x128xf32, #tpu.memory_space<vmem>>, %arg3: memref<1x128xf32, #tpu.memory_space<vmem>>, %arg4: memref<128x64xf32, #tpu.memory_space<vmem>>, %arg5: memref<1x64xf32, #tpu.memory_space<vmem>>, %arg6: memref<64x64xf32, #tpu.memory_space<vmem>>, %arg7: memref<1x64xf32, #tpu.memory_space<vmem>>, %arg8: memref<64x128xf32, #tpu.memory_space<vmem>>, %arg9: memref<1x128xf32, #tpu.memory_space<vmem>>, %arg10: memref<128x128xf32, #tpu.memory_space<vmem>>, %arg11: memref<1x128xf32, #tpu.memory_space<vmem>>, %arg12: memref<8x4xf32, #tpu.memory_space<vmem>>) attributes {dimension_semantics = [#tpu.dimension_semantics<parallel>], iteration_bounds = array<i64: 1>, scalar_prefetch = 0 : i64, scratch_operands = 0 : i64, tpu.core_type = #tpu.core_type<tc>, window_params = [{transform_indices = @transform_0, window_bounds = array<i64: 8, 32>}, {pipeline_mode = #tpu.pipeline_mode<synchronous>, transform_indices = @transform_1, window_bounds = array<i64: 32, 128>}, {pipeline_mode = #tpu.pipeline_mode<synchronous>, transform_indices = @transform_2, window_bounds = array<i64: 1, 128>}, {pipeline_mode = #tpu.pipeline_mode<synchronous>, transform_indices = @transform_3, window_bounds = array<i64: 128, 64>}, {pipeline_mode = #tpu.pipeline_mode<synchronous>, transform_indices = @transform_4, window_bounds = array<i64: 1, 64>}, {pipeline_mode = #tpu.pipeline_mode<synchronous>, transform_indices = @transform_5, window_bounds = array<i64: 64, 64>}, {pipeline_mode = #tpu.pipeline_mode<synchronous>, transform_indices = @transform_6, window_bounds = array<i64: 1, 64>}, {pipeline_mode = #tpu.pipeline_mode<synchronous>, transform_indices = @transform_7, window_bounds = array<i64: 64, 128>}, {pipeline_mode = #tpu.pipeline_mode<synchronous>, transform_indices = @transform_8, window_bounds = array<i64: 1, 128>}, {pipeline_mode = #tpu.pipeline_mode<synchronous>, transform_indices = @transform_9, window_bounds = array<i64: 128, 128>}, {pipeline_mode = #tpu.pipeline_mode<synchronous>, transform_indices = @transform_10, window_bounds = array<i64: 1, 128>}, {transform_indices = @transform_11, window_bounds = array<i64: 8, 4>}]} {
    %c0 = arith.constant 0 : index
    %c0_0 = arith.constant 0 : index
    %0 = vector.load %arg1[%c0, %c0_0] : memref<8x32xf32, #tpu.memory_space<vmem>>, vector<8x32xf32>
    %c0_1 = arith.constant 0 : index
    %c0_2 = arith.constant 0 : index
    %1 = vector.load %arg2[%c0_1, %c0_2] : memref<32x128xf32, #tpu.memory_space<vmem>>, vector<32x128xf32>
    %cst = arith.constant dense<0.000000e+00> : vector<8x128xf32>
    %2 = tpu.matmul %0, %1, %cst {dimension_numbers = #tpu.dot_dimension_numbers<[1], [0], [0], [1], [0, 0, 1, 1], [], []>} : vector<8x32xf32>, vector<32x128xf32>, vector<8x128xf32> -> vector<8x128xf32>
    %c0_3 = arith.constant 0 : index
    %c0_4 = arith.constant 0 : index
    %3 = vector.load %arg3[%c0_3, %c0_4] : memref<1x128xf32, #tpu.memory_space<vmem>>, vector<1x128xf32>
    %4 = vector.broadcast %3 : vector<1x128xf32> to vector<8x128xf32>
    %5 = arith.addf %2, %4 : vector<8x128xf32>
    %cst_5 = arith.constant 5.000000e-01 : f32
    %6 = vector.broadcast %cst_5 : f32 to vector<8x128xf32>
    %7 = arith.mulf %6, %5 : vector<8x128xf32>
    %cst_6 = arith.constant 0.707106769 : f32
    %8 = vector.broadcast %cst_6 : f32 to vector<8x128xf32>
    %9 = arith.mulf %5, %8 : vector<8x128xf32>
    %10 = math.erf %9 : vector<8x128xf32>
    %cst_7 = arith.constant 1.000000e+00 : f32
    %11 = vector.broadcast %cst_7 : f32 to vector<8x128xf32>
    %12 = arith.addf %11, %10 : vector<8x128xf32>
    %13 = arith.mulf %7, %12 : vector<8x128xf32>
    %c0_8 = arith.constant 0 : index
    %c0_9 = arith.constant 0 : index
    %14 = vector.load %arg4[%c0_8, %c0_9] : memref<128x64xf32, #tpu.memory_space<vmem>>, vector<128x64xf32>
    %cst_10 = arith.constant dense<0.000000e+00> : vector<8x64xf32>
    %15 = tpu.matmul %13, %14, %cst_10 {dimension_numbers = #tpu.dot_dimension_numbers<[1], [0], [0], [1], [0, 0, 1, 1], [], []>} : vector<8x128xf32>, vector<128x64xf32>, vector<8x64xf32> -> vector<8x64xf32>
    %c0_11 = arith.constant 0 : index
    %c0_12 = arith.constant 0 : index
    %16 = vector.load %arg5[%c0_11, %c0_12] : memref<1x64xf32, #tpu.memory_space<vmem>>, vector<1x64xf32>
    %17 = vector.broadcast %16 : vector<1x64xf32> to vector<8x64xf32>
    %18 = arith.addf %15, %17 : vector<8x64xf32>
    %cst_13 = arith.constant 5.000000e-01 : f32
    %19 = vector.broadcast %cst_13 : f32 to vector<8x64xf32>
    %20 = arith.mulf %19, %18 : vector<8x64xf32>
    %cst_14 = arith.constant 0.707106769 : f32
    %21 = vector.broadcast %cst_14 : f32 to vector<8x64xf32>
    %22 = arith.mulf %18, %21 : vector<8x64xf32>
    %23 = math.erf %22 : vector<8x64xf32>
    %cst_15 = arith.constant 1.000000e+00 : f32
    %24 = vector.broadcast %cst_15 : f32 to vector<8x64xf32>
    %25 = arith.addf %24, %23 : vector<8x64xf32>
    %26 = arith.mulf %20, %25 : vector<8x64xf32>
    %c0_16 = arith.constant 0 : index
    %c0_17 = arith.constant 0 : index
    %27 = vector.load %arg6[%c0_16, %c0_17] : memref<64x64xf32, #tpu.memory_space<vmem>>, vector<64x64xf32>
    %cst_18 = arith.constant dense<0.000000e+00> : vector<8x64xf32>
    %28 = tpu.matmul %26, %27, %cst_18 {dimension_numbers = #tpu.dot_dimension_numbers<[1], [0], [0], [1], [0, 0, 1, 1], [], []>} : vector<8x64xf32>, vector<64x64xf32>, vector<8x64xf32> -> vector<8x64xf32>
    %c0_19 = arith.constant 0 : index
    %c0_20 = arith.constant 0 : index
    %29 = vector.load %arg7[%c0_19, %c0_20] : memref<1x64xf32, #tpu.memory_space<vmem>>, vector<1x64xf32>
    %30 = vector.broadcast %29 : vector<1x64xf32> to vector<8x64xf32>
    %31 = arith.addf %28, %30 : vector<8x64xf32>
    %cst_21 = arith.constant 5.000000e-01 : f32
    %32 = vector.broadcast %cst_21 : f32 to vector<8x64xf32>
    %33 = arith.mulf %32, %31 : vector<8x64xf32>
    %cst_22 = arith.constant 0.707106769 : f32
    %34 = vector.broadcast %cst_22 : f32 to vector<8x64xf32>
    %35 = arith.mulf %31, %34 : vector<8x64xf32>
    %36 = math.erf %35 : vector<8x64xf32>
    %cst_23 = arith.constant 1.000000e+00 : f32
    %37 = vector.broadcast %cst_23 : f32 to vector<8x64xf32>
    %38 = arith.addf %37, %36 : vector<8x64xf32>
    %39 = arith.mulf %33, %38 : vector<8x64xf32>
    %40 = arith.addf %26, %39 : vector<8x64xf32>
    %c0_24 = arith.constant 0 : index
    %c0_25 = arith.constant 0 : index
    %41 = vector.load %arg8[%c0_24, %c0_25] : memref<64x128xf32, #tpu.memory_space<vmem>>, vector<64x128xf32>
    %cst_26 = arith.constant dense<0.000000e+00> : vector<8x128xf32>
    %42 = tpu.matmul %40, %41, %cst_26 {dimension_numbers = #tpu.dot_dimension_numbers<[1], [0], [0], [1], [0, 0, 1, 1], [], []>} : vector<8x64xf32>, vector<64x128xf32>, vector<8x128xf32> -> vector<8x128xf32>
    %c0_27 = arith.constant 0 : index
    %c0_28 = arith.constant 0 : index
    %43 = vector.load %arg9[%c0_27, %c0_28] : memref<1x128xf32, #tpu.memory_space<vmem>>, vector<1x128xf32>
    %44 = vector.broadcast %43 : vector<1x128xf32> to vector<8x128xf32>
    %45 = arith.addf %42, %44 : vector<8x128xf32>
    %cst_29 = arith.constant 5.000000e-01 : f32
    %46 = vector.broadcast %cst_29 : f32 to vector<8x128xf32>
    %47 = arith.mulf %46, %45 : vector<8x128xf32>
    %cst_30 = arith.constant 0.707106769 : f32
    %48 = vector.broadcast %cst_30 : f32 to vector<8x128xf32>
    %49 = arith.mulf %45, %48 : vector<8x128xf32>
    %50 = math.erf %49 : vector<8x128xf32>
    %cst_31 = arith.constant 1.000000e+00 : f32
    %51 = vector.broadcast %cst_31 : f32 to vector<8x128xf32>
    %52 = arith.addf %51, %50 : vector<8x128xf32>
    %53 = arith.mulf %47, %52 : vector<8x128xf32>
    %c0_32 = arith.constant 0 : index
    %c0_33 = arith.constant 0 : index
    %54 = vector.load %arg10[%c0_32, %c0_33] : memref<128x128xf32, #tpu.memory_space<vmem>>, vector<128x128xf32>
    %cst_34 = arith.constant dense<0.000000e+00> : vector<8x128xf32>
    %55 = tpu.matmul %53, %54, %cst_34 {dimension_numbers = #tpu.dot_dimension_numbers<[1], [0], [0], [1], [0, 0, 1, 1], [], []>} : vector<8x128xf32>, vector<128x128xf32>, vector<8x128xf32> -> vector<8x128xf32>
    %c0_35 = arith.constant 0 : index
    %c0_36 = arith.constant 0 : index
    %56 = vector.load %arg11[%c0_35, %c0_36] : memref<1x128xf32, #tpu.memory_space<vmem>>, vector<1x128xf32>
    %57 = vector.broadcast %56 : vector<1x128xf32> to vector<8x128xf32>
    %58 = arith.addf %55, %57 : vector<8x128xf32>
    %59 = vector.extract_strided_slice %58 {offsets = [0, 0], sizes = [8, 4], strides = [1, 1]} : vector<8x128xf32> to vector<8x4xf32>
    %c0_37 = arith.constant 0 : index
    %c0_38 = arith.constant 0 : index
    %60 = vector.load %arg12[%c0_37, %c0_38] : memref<8x4xf32, #tpu.memory_space<vmem>>, vector<8x4xf32>
    tpu.vector_store %arg12[%c0_37, %c0_38], %59 {strides = array<i32>} : memref<8x4xf32, #tpu.memory_space<vmem>>, vector<8x4xf32>,
    return
  }
  func.func @transform_0(%arg0: i32) -> (i32, i32) {
    %c0_i32 = arith.constant 0 : i32
    %c0_i32_0 = arith.constant 0 : i32
    return %arg0, %c0_i32 : i32, i32
  }
  func.func @transform_1(%arg0: i32) -> (i32, i32) {
    %c0_i32 = arith.constant 0 : i32
    %c0_i32_0 = arith.constant 0 : i32
    %c0_i32_1 = arith.constant 0 : i32
    return %c0_i32, %c0_i32_0 : i32, i32
  }
  func.func @transform_2(%arg0: i32) -> (i32, i32) {
    %c0_i32 = arith.constant 0 : i32
    %c0_i32_0 = arith.constant 0 : i32
    %c0_i32_1 = arith.constant 0 : i32
    return %c0_i32, %c0_i32_0 : i32, i32
  }
  func.func @transform_3(%arg0: i32) -> (i32, i32) {
    %c0_i32 = arith.constant 0 : i32
    %c0_i32_0 = arith.constant 0 : i32
    %c0_i32_1 = arith.constant 0 : i32
    return %c0_i32, %c0_i32_0 : i32, i32
  }
  func.func @transform_4(%arg0: i32) -> (i32, i32) {
    %c0_i32 = arith.constant 0 : i32
    %c0_i32_0 = arith.constant 0 : i32
    %c0_i32_1 = arith.constant 0 : i32
    return %c0_i32, %c0_i32_0 : i32, i32
  }
  func.func @transform_5(%arg0: i32) -> (i32, i32) {
    %c0_i32 = arith.constant 0 : i32
    %c0_i32_0 = arith.constant 0 : i32
    %c0_i32_1 = arith.constant 0 : i32
    return %c0_i32, %c0_i32_0 : i32, i32
  }
  func.func @transform_6(%arg0: i32) -> (i32, i32) {
    %c0_i32 = arith.constant 0 : i32
    %c0_i32_0 = arith.constant 0 : i32
    %c0_i32_1 = arith.constant 0 : i32
    return %c0_i32, %c0_i32_0 : i32, i32
  }
  func.func @transform_7(%arg0: i32) -> (i32, i32) {
    %c0_i32 = arith.constant 0 : i32
    %c0_i32_0 = arith.constant 0 : i32
    %c0_i32_1 = arith.constant 0 : i32
    return %c0_i32, %c0_i32_0 : i32, i32
  }
  func.func @transform_8(%arg0: i32) -> (i32, i32) {
    %c0_i32 = arith.constant 0 : i32
    %c0_i32_0 = arith.constant 0 : i32
    %c0_i32_1 = arith.constant 0 : i32
    return %c0_i32, %c0_i32_0 : i32, i32
  }
  func.func @transform_9(%arg0: i32) -> (i32, i32) {
    %c0_i32 = arith.constant 0 : i32
    %c0_i32_0 = arith.constant 0 : i32
    %c0_i32_1 = arith.constant 0 : i32
    return %c0_i32, %c0_i32_0 : i32, i32
  }
  func.func @transform_10(%arg0: i32) -> (i32, i32) {
    %c0_i32 = arith.constant 0 : i32
    %c0_i32_0 = arith.constant 0 : i32
    %c0_i32_1 = arith.constant 0 : i32
    return %c0_i32, %c0_i32_0 : i32, i32
  }
  func.func @transform_11(%arg0: i32) -> (i32, i32) {
    %c0_i32 = arith.constant 0 : i32
    %c0_i32_0 = arith.constant 0 : i32
    return %arg0, %c0_i32 : i32, i32
  }
}

</mosaic_0001>

<bundles_post_ra>
// kernel: tpu_custom_call.1
= control target key start
LH: loop header
LB: loop body
LE: loop exit
PB: predicated region body
PF: predicated region fallthrough
CT: control target
= control target key end

     0   :  { %16 = vsyncpa [#allocation3], 0  ;;  %s1063_s0 = inlined_call_operand.vmem [shape: f32[8,32], index: 0, kind: input, shape index: {}]   ;;  %s1064_s1 = inlined_call_operand.hbm [shape: f32[32,128], index: 1, kind: input, shape index: {}]   ;;  %s1065_s2 = inlined_call_operand.vmem [shape: f32[1,128], index: 2, kind: input, shape index: {}]   ;;  %s1066_s3 = inlined_call_operand.vmem [shape: f32[128,64], index: 3, kind: input, shape index: {}]   ;;  %s1067_s4 = inlined_call_operand.vmem [shape: f32[1,64], index: 4, kind: input, shape index: {}]   ;;  %s1068_s5 = inlined_call_operand.vmem [shape: f32[64,64], index: 5, kind: input, shape index: {}]   ;;  %s1069_s6 = inlined_call_operand.vmem [shape: f32[1,64], index: 6, kind: input, shape index: {}]   ;;  %s1070_s7 = inlined_call_operand.hbm [shape: f32[64,128], index: 7, kind: input, shape index: {}]   ;;  %s1071_s8 = inlined_call_operand.vmem [shape: f32[1,128], index: 8, kind: input, shape index: {}]   ;;  %s1072_s9 = inlined_call_operand.vmem [shape: f32[128,128], index: 9, kind: input, shape index: {}]   ;;  %s1073_s10 = inlined_call_operand.vmem [shape: f32[1,128], index: 10, kind: input, shape index: {}]   ;;  %s1074_s11 = inlined_call_operand.vmem [shape: f32[8,4], index: 11, kind: output, shape index: {}]  }
   0x1   :  { %17 = vsyncpa [#allocation5], 0  ;;  %s786_s17 = smov [#allocation2]  }
   0x2   :  { %s25_s18 = sshll.u32 %s786_s17, 4  ;;  %s26_s18 = int_to_ptr.vmem [resolvable:$true] %s25_s18 }
   0x3   :  { %s750_s19 = scalar_lea.vmem %s26_s18, 512  ;;  %p755_p1 = scmp.lt.s32.totalorder %s26_s18, %s26_s18 }
   0x4   :  { %p751_p0 = scmp.ne.s32.totalorder %s26_s18, %s750_s19  ;;  %p756_p2 = scmp.lt.s32.totalorder %s750_s19, %s750_s19 }
   0x6   :  { %p757_p3 = por %p756_p2, %p755_p1 }
   0x8   :  { %p758_p4 = pnand %p757_p3, %p751_p0 }
   0xa   :  { %761 = shalt.err (!%p758_p4)
}
   0xb   :  { %s787_s20 = smov 128   ;;  %s788_s21 = smov 8  }
   0xc   :  { %31 = dma.hbm_to_vmem [thread:$0]  %s1064_s1, 512, %s26_s18, [#allocation3], %s787_s20, %s787_s20, %s788_s21  }
   0xd   :  { %s789_s24 = smov [#allocation4]  }
   0xe   :  { %s47_s25 = sshll.u32 %s789_s24, 4  ;;  %s48_s25 = int_to_ptr.vmem [resolvable:$true] %s47_s25 }
   0xf   :  { %s770_s26 = scalar_lea.vmem %s48_s25, 1024  ;;  %p775_p6 = scmp.lt.s32.totalorder %s48_s25, %s48_s25 }
  0x10   :  { %p771_p5 = scmp.ne.s32.totalorder %s48_s25, %s770_s26  ;;  %p776_p7 = scmp.lt.s32.totalorder %s770_s26, %s770_s26 }
  0x12   :  { %p777_p8 = por %p776_p7, %p775_p6 }
  0x14   :  { %p778_p9 = pnand %p777_p8, %p771_p5 }
  0x16   :  { %781 = shalt.err (!%p778_p9)
}
  0x17   :  { %53 = dma.hbm_to_vmem [thread:$0]  %s1070_s7, 1024, %s48_s25, [#allocation5], %s787_s20, %s787_s20, %s788_s21  }
  0x18   :  { %782 = dma.done.wait [#allocation3], 512  }
  0x19   :  { %783 = vsyncadd [#allocation3], 4294966784 }
  0x1a   :  { %784 = dma.done.wait [#allocation5], 1024  }
  0x1b   :  { %785 = vsyncadd [#allocation5], 4294966272  ;;  %v790_v0 = vmov 0.0   ;;  %vm791_vm0 = vmmov 0   ;;  %v70_v1 = vld [vmem:[#allocation2 + $0x18] sm:$0xff]  ;;  %v69_v2 = vld [vmem:[#allocation2 + $0x10] sm:$0xff] }
  0x1c   :  { %609 = vmatprep.subr.mxu0 %v790_v0  ;;  %617 = vmatprep.mubr.msk.f32.mxu0 %vm791_vm0, %v790_v0  ;;  %v172_v3 = vld [vmem:[%s1066_s3 + $0x78] sm:$0xff]  ;;  %v68_v4 = vld [vmem:[#allocation2 + $0x8] sm:$0xff]  ;;  %v171_v5 = vld [vmem:[%s1066_s3 + $0x70] sm:$0xff]  ;;  %vm78_vm1 = vcmask 261120   ;;  %vm270_vm2 = vcmask 523264   ;;  %vm536_vm3 = vcmask 31744  }
  0x1d   :  { %620 = vmatprep.subr.mxu1 %v790_v0  ;;  %652 = vmatprep.mubr.msk.f32.mxu1 %vm791_vm0, %v790_v0  ;;  %v170_v6 = vld [vmem:[%s1066_s3 + $0x68] sm:$0xff]  ;;  %v67_v7 = vld [vmem:[#allocation2] sm:$0xff]  ;;  %v168_v10 = vld [vmem:[%s1066_s3 + $0x58] sm:$0xff] }
  0x1e   :  { %610 = vmatpush3.msra.mxu0 %v70_v1  ;;  %621 = vmatpush3.msra.mxu1 %v172_v3  ;;  %v66_v8 = vld [vmem:[%s1063_s0] sm:$0xff]  ;;  %v167_v11 = vld [vmem:[%s1066_s3 + $0x50] sm:$0xff]  ;;  %v166_v12 = vld [vmem:[%s1066_s3 + $0x48] sm:$0xff] }
  0x1f   :  { %611 = vmatprep.subr.mxu0 %v790_v0  ;;  %622 = vmatprep.subr.mxu1 %v790_v0  ;;  %v169_v9 = vld [vmem:[%s1066_s3 + $0x60] sm:$0xff]  ;;  %v164_v14 = vld [vmem:[%s1066_s3 + $0x38] sm:$0xff]  ;;  %v163_v15 = vld [vmem:[%s1066_s3 + $0x30] sm:$0xff] }
  0x20   :  { %612 = vmatpush3.msra.mxu0 %v69_v2  ;;  %623 = vmatpush3.msra.mxu1 %v171_v5  ;;  %v165_v13 = vld [vmem:[%s1066_s3 + $0x40] sm:$0xff]  ;;  %v162_v16 = vld [vmem:[%s1066_s3 + $0x28] sm:$0xff]  ;;  %v160_v18 = vld [vmem:[%s1066_s3 + $0x18] sm:$0xff] }
  0x21   :  { %613 = vmatprep.subr.mxu0 %v790_v0  ;;  %624 = vmatprep.subr.mxu1 %v790_v0  ;;  %v161_v17 = vld [vmem:[%s1066_s3 + $0x20] sm:$0xff]  ;;  %v159_v19 = vld [vmem:[%s1066_s3 + $0x10] sm:$0xff]  ;;  %v158_v20 = vld [vmem:[%s1066_s3 + $0x8] sm:$0xff] }
  0x22   :  { %614 = vmatpush3.msra.mxu0 %v68_v4  ;;  %625 = vmatpush3.msra.mxu1 %v170_v6  ;;  %v157_v21 = vld [vmem:[%s1066_s3] sm:$0xff]  ;;  %v262_v31 = vld [vmem:[%s1068_s5 + $0x38] sm:$0xff]  ;;  %v261_v32 = vld [vmem:[%s1068_s5 + $0x30] sm:$0xff] }
  0x23   :  { %615 = vmatprep.subr.mxu0 %v790_v0  ;;  %626 = vmatprep.subr.mxu1 %v790_v0  ;;  %v544_v22 = vld [vmem:[%s1065_s2] ss:$0 sm:$0xff]  ;;  %v260_v33 = vld [vmem:[%s1068_s5 + $0x28] sm:$0xff]  ;;  %v258_v35 = vld [vmem:[%s1068_s5 + $0x18] sm:$0xff] }
  0x24   :  { %616 = vmatpush3.msra.mxu0 %v67_v7  ;;  %627 = vmatpush3.msra.mxu1 %v169_v9  ;;  %v259_v34 = vld [vmem:[%s1068_s5 + $0x20] sm:$0xff]  ;;  %v257_v36 = vld [vmem:[%s1068_s5 + $0x10] sm:$0xff]  ;;  %v256_v37 = vld [vmem:[%s1068_s5 + $0x8] sm:$0xff] }
  0x25   :  { %618 = vmatmul.mubr.msk.f32.vlgmr.msra.gmra.mxu0 %vm78_vm1, %v66_v8  ;;  %628 = vmatprep.subr.mxu1 %v790_v0  ;;  %v255_v38 = vld [vmem:[%s1068_s5] sm:$0xff]  ;;  %v357_v48 = vld [vmem:[#allocation4 + $0x38] sm:$0xff]  ;;  %v356_v49 = vld [vmem:[#allocation4 + $0x30] sm:$0xff] }
  0x26   :  { %655 = vmatprep.subr.mxu0 %v790_v0  ;;  %671 = vmatprep.mubr.msk.f32.mxu0 %vm791_vm0, %v790_v0  ;;  %v546_v39 = vld [vmem:[%s1067_s4] ss:$0 sm:$0xff]  ;;  %v355_v50 = vld [vmem:[#allocation4 + $0x28] sm:$0xff]  ;;  %v353_v52 = vld [vmem:[#allocation4 + $0x18] sm:$0xff] }
  0x27   :  { %629 = vmatpush3.msra.mxu1 %v168_v10  ;;  %656 = vmatpush3.msra.mxu0 %v262_v31  ;;  %v354_v51 = vld [vmem:[#allocation4 + $0x20] sm:$0xff]  ;;  %v352_v53 = vld [vmem:[#allocation4 + $0x10] sm:$0xff]  ;;  %v351_v54 = vld [vmem:[#allocation4 + $0x8] sm:$0xff] }
  0x28   :  { %630 = vmatprep.subr.mxu1 %v790_v0  ;;  %657 = vmatprep.subr.mxu0 %v790_v0  ;;  %v350_v55 = vld [vmem:[#allocation4] sm:$0xff]  ;;  %v458_v56 = vld [vmem:[%s1072_s9 + $0x78] sm:$0xff]  ;;  %v457_v57 = vld [vmem:[%s1072_s9 + $0x70] sm:$0xff] }
  0x29   :  { %631 = vmatpush3.msra.mxu1 %v167_v11  ;;  %658 = vmatpush3.msra.mxu0 %v261_v32  ;;  %v456_v58 = vld [vmem:[%s1072_s9 + $0x68] sm:$0xff]  ;;  %v455_v59 = vld [vmem:[%s1072_s9 + $0x60] sm:$0xff]  ;;  %v454_v7 = vld [vmem:[%s1072_s9 + $0x58] sm:$0xff] }
  0x2a   :  { %632 = vmatprep.subr.mxu1 %v790_v0  ;;  %659 = vmatprep.subr.mxu0 %v790_v0  ;;  %v547_v60 = vld [vmem:[%s1069_s6] ss:$0 sm:$0xff]  ;;  %v453_v8 = vld [vmem:[%s1072_s9 + $0x50] sm:$0xff]  ;;  %v452_v9 = vld [vmem:[%s1072_s9 + $0x48] sm:$0xff] }
  0x2b   :  { %633 = vmatpush3.msra.mxu1 %v166_v12  ;;  %660 = vmatpush3.msra.mxu0 %v260_v33  ;;  %v451_v10 = vld [vmem:[%s1072_s9 + $0x40] sm:$0xff]  ;;  %v450_v11 = vld [vmem:[%s1072_s9 + $0x38] sm:$0xff]  ;;  %v449_v12 = vld [vmem:[%s1072_s9 + $0x30] sm:$0xff] }
  0x2c   :  { %634 = vmatprep.subr.mxu1 %v790_v0  ;;  %661 = vmatprep.subr.mxu0 %v790_v0 }
  0x2d   :  { %635 = vmatpush3.msra.mxu1 %v165_v13  ;;  %662 = vmatpush3.msra.mxu0 %v259_v34  ;;  %v448_v13 = vld [vmem:[%s1072_s9 + $0x28] sm:$0xff] }
  0x2e   :  { %636 = vmatprep.subr.mxu1 %v790_v0  ;;  %663 = vmatprep.subr.mxu0 %v790_v0 }
  0x2f   :  { %637 = vmatpush3.msra.mxu1 %v164_v14  ;;  %664 = vmatpush3.msra.mxu0 %v258_v35  ;;  %v447_v14 = vld [vmem:[%s1072_s9 + $0x20] sm:$0xff] }
  0x30   :  { %638 = vmatprep.subr.mxu1 %v790_v0  ;;  %665 = vmatprep.subr.mxu0 %v790_v0 }
  0x31   :  { %639 = vmatpush3.msra.mxu1 %v163_v15  ;;  %666 = vmatpush3.msra.mxu0 %v257_v36  ;;  %v446_v15 = vld [vmem:[%s1072_s9 + $0x18] sm:$0xff] }
  0x32   :  { %640 = vmatprep.subr.mxu1 %v790_v0  ;;  %667 = vmatprep.subr.mxu0 %v790_v0 }
  0x33   :  { %641 = vmatpush3.msra.mxu1 %v162_v16  ;;  %668 = vmatpush3.msra.mxu0 %v256_v37  ;;  %v445_v16 = vld [vmem:[%s1072_s9 + $0x10] sm:$0xff] }
  0x34   :  { %642 = vmatprep.subr.mxu1 %v790_v0  ;;  %669 = vmatprep.subr.mxu0 %v790_v0 }
  0x35   :  { %643 = vmatpush3.msra.mxu1 %v161_v17  ;;  %670 = vmatpush3.msra.mxu0 %v255_v38  ;;  %v444_v17 = vld [vmem:[%s1072_s9 + $0x8] sm:$0xff] }
  0x36   :  { %644 = vmatprep.subr.mxu1 %v790_v0  ;;  %674 = vmatprep.subr.mxu0 %v790_v0 }
  0x37   :  { %645 = vmatpush3.msra.mxu1 %v160_v18  ;;  %v443_v18 = vld [vmem:[%s1072_s9] sm:$0xff] }
  0x38   :  { %646 = vmatprep.subr.mxu1 %v790_v0 }
  0x39   :  { %647 = vmatpush3.msra.mxu1 %v159_v19  ;;  %v549_v19 = vld [vmem:[%s1071_s8] ss:$0 sm:$0xff] }
  0x3a   :  { %648 = vmatprep.subr.mxu1 %v790_v0 }
  0x3b   :  { %649 = vmatpush3.msra.mxu1 %v158_v20 }
  0x3c   :  { %650 = vmatprep.subr.mxu1 %v790_v0 }
  0x3d   :  { %651 = vmatpush3.msra.mxu1 %v157_v21 }
  0x3e   :  { %693 = vmatprep.subr.mxu1 %v790_v0 }
  0xe5   :  { %v148_v23 = vpop.f32.mrf.mxu0 }
  0xe6   :  { %v149_v24 = vadd.f32 %v544_v22, %v148_v23 }
  0xe7   :  { %v619_v25 = vpop.f32.mrf.mxu0 }
  0xe8   :  { %v153_v26 = vmul.f32 0.70710677, %v149_v24  ;;  %v152_v28 = vmul.f32 0.5, %v149_v24 }
  0xea   :  { %734 = verf.f32 %v153_v26 }
  0xf7   :  { %v735_v27 = vpop.eup %734 }
  0xf8   :  { %v155_v29 = vadd.f32 1.0, %v735_v27 }
  0xfa   :  { %v156_v30 = vmul.f32 %v155_v29, %v152_v28 }
  0xfc   :  { %653 = vmatmul.mubr.f32.vlgmr.msra.gmra.mxu1 %v156_v30 }
  0xfd   :  { %725 = vmatprep.mubr.msk.f32.mxu1 %vm791_vm0, %v790_v0  ;;  %694 = vmatpush3.msra.mxu1 %v458_v56 }
  0xfe   :  { %695 = vmatprep.subr.mxu1 %v790_v0 }
  0xff   :  { %696 = vmatpush3.msra.mxu1 %v457_v57 }
 0x100   :  { %697 = vmatprep.subr.mxu1 %v790_v0 }
 0x101   :  { %698 = vmatpush3.msra.mxu1 %v456_v58 }
 0x102   :  { %699 = vmatprep.subr.mxu1 %v790_v0 }
 0x103   :  { %700 = vmatpush3.msra.mxu1 %v455_v59 }
 0x104   :  { %701 = vmatprep.subr.mxu1 %v790_v0 }
 0x105   :  { %702 = vmatpush3.msra.mxu1 %v454_v7 }
 0x106   :  { %703 = vmatprep.subr.mxu1 %v790_v0 }
 0x107   :  { %704 = vmatpush3.msra.mxu1 %v453_v8 }
 0x108   :  { %705 = vmatprep.subr.mxu1 %v790_v0 }
 0x109   :  { %706 = vmatpush3.msra.mxu1 %v452_v9 }
 0x10a   :  { %707 = vmatprep.subr.mxu1 %v790_v0 }
 0x10b   :  { %708 = vmatpush3.msra.mxu1 %v451_v10 }
 0x10c   :  { %709 = vmatprep.subr.mxu1 %v790_v0 }
 0x10d   :  { %710 = vmatpush3.msra.mxu1 %v450_v11 }
 0x10e   :  { %711 = vmatprep.subr.mxu1 %v790_v0 }
 0x10f   :  { %712 = vmatpush3.msra.mxu1 %v449_v12 }
 0x110   :  { %713 = vmatprep.subr.mxu1 %v790_v0 }
 0x111   :  { %714 = vmatpush3.msra.mxu1 %v448_v13 }
 0x112   :  { %715 = vmatprep.subr.mxu1 %v790_v0 }
 0x113   :  { %716 = vmatpush3.msra.mxu1 %v447_v14 }
 0x114   :  { %717 = vmatprep.subr.mxu1 %v790_v0 }
 0x115   :  { %718 = vmatpush3.msra.mxu1 %v446_v15 }
 0x116   :  { %719 = vmatprep.subr.mxu1 %v790_v0 }
 0x117   :  { %720 = vmatpush3.msra.mxu1 %v445_v16 }
 0x118   :  { %721 = vmatprep.subr.mxu1 %v790_v0 }
 0x119   :  { %722 = vmatpush3.msra.mxu1 %v444_v17 }
 0x11a   :  { %723 = vmatprep.subr.mxu1 %v790_v0 }
 0x11b   :  { %724 = vmatpush3.msra.mxu1 %v443_v18 }
 0x1bc   :  { %v246_v40 = vpop.f32.mrf.mxu1 }
 0x1bd   :  { %v247_v41 = vadd.f32 %v546_v39, %v246_v40 }
 0x1be   :  { %v654_v42 = vpop.f32.mrf.mxu1 }
 0x1bf   :  { %v251_v43 = vmul.f32 0.70710677, %v247_v41  ;;  %v250_v45 = vmul.f32 0.5, %v247_v41 }
 0x1c1   :  { %736 = verf.f32 %v251_v43 }
 0x1ce   :  { %v737_v44 = vpop.eup %736 }
 0x1cf   :  { %v253_v46 = vadd.f32 1.0, %v737_v44 }
 0x1d1   :  { %v254_v47 = vmul.f32 %v253_v46, %v250_v45 }
 0x1d3   :  { %672 = vmatmul.mubr.msk.f32.vlgmr.msra.gmra.mxu0 %vm270_vm2, %v254_v47 }
 0x1d4   :  { %690 = vmatprep.mubr.msk.f32.mxu0 %vm791_vm0, %v790_v0  ;;  %675 = vmatpush3.msra.mxu0 %v357_v48 }
 0x1d5   :  { %676 = vmatprep.subr.mxu0 %v790_v0 }
 0x1d6   :  { %677 = vmatpush3.msra.mxu0 %v356_v49 }
 0x1d7   :  { %678 = vmatprep.subr.mxu0 %v790_v0 }
 0x1d8   :  { %679 = vmatpush3.msra.mxu0 %v355_v50 }
 0x1d9   :  { %680 = vmatprep.subr.mxu0 %v790_v0 }
 0x1da   :  { %681 = vmatpush3.msra.mxu0 %v354_v51 }
 0x1db   :  { %682 = vmatprep.subr.mxu0 %v790_v0 }
 0x1dc   :  { %683 = vmatpush3.msra.mxu0 %v353_v52 }
 0x1dd   :  { %684 = vmatprep.subr.mxu0 %v790_v0 }
 0x1de   :  { %685 = vmatpush3.msra.mxu0 %v352_v53 }
 0x1df   :  { %686 = vmatprep.subr.mxu0 %v790_v0 }
 0x1e0   :  { %687 = vmatpush3.msra.mxu0 %v351_v54 }
 0x1e1   :  { %688 = vmatprep.subr.mxu0 %v790_v0  ;;  %v551_v0 = vld [vmem:[%s1073_s10] ss:$0 sm:$0xff] }
 0x1e2   :  { %689 = vmatpush3.msra.mxu0 %v350_v55 }
 0x293   :  { %v340_v61 = vpop.f32.mrf.mxu0 }
 0x294   :  { %v341_v62 = vadd.f32 %v547_v60, %v340_v61 }
 0x295   :  { %v673_v63 = vpop.f32.mrf.mxu0 }
 0x296   :  { %v345_v1 = vmul.f32 0.70710677, %v341_v62  ;;  %v344_v3 = vmul.f32 0.5, %v341_v62 }
 0x298   :  { %738 = verf.f32 %v345_v1 }
 0x2a5   :  { %v739_v2 = vpop.eup %738 }
 0x2a6   :  { %v347_v4 = vadd.f32 1.0, %v739_v2 }
 0x2a8   :  { %v348_v5 = vmul.f32 %v347_v4, %v344_v3 }
 0x2aa   :  { %v349_v6 = vadd.f32 %v348_v5, %v254_v47 }
 0x2ac   :  { %691 = vmatmul.mubr.msk.f32.vlgmr.msra.gmra.mxu0 %vm270_vm2, %v349_v6 }
 0x36c   :  { %v434_v20 = vpop.f32.mrf.mxu0 }
 0x36d   :  { %v435_v21 = vadd.f32 %v549_v19, %v434_v20 }
 0x36e   :  { %v692_v22 = vpop.f32.mrf.mxu0 }
 0x36f   :  { %v439_v23 = vmul.f32 0.70710677, %v435_v21  ;;  %v438_v25 = vmul.f32 0.5, %v435_v21 }
 0x371   :  { %740 = verf.f32 %v439_v23 }
 0x37e   :  { %v741_v24 = vpop.eup %740 }
 0x37f   :  { %v441_v26 = vadd.f32 1.0, %v741_v24 }
 0x381   :  { %v442_v27 = vmul.f32 %v441_v26, %v438_v25 }
 0x383   :  { %726 = vmatmul.mubr.f32.vlgmr.msra.gmra.mxu1 %v442_v27 }
 0x443   :  { %v532_v28 = vpop.f32.mrf.mxu1 }
 0x444   :  { %v533_v29 = vadd.f32 %v551_v0, %v532_v28 }
 0x445   :  { %v727_v30 = vpop.f32.mrf.mxu1 }
 0x446   :  { %537 = vst.msk [vmem:[%s1074_s11] sm:$0xff] %vm536_vm3, %v533_v29 }
 0x447   :  { %542 = vsyncpa [#allocation3], 1 }
 0x448   :  { %543 = vsyncpa [#allocation5], 1 }

</bundles_post_ra>
